<compile_context>
chip_gen: v5e
topology: v5e:2x2
jax: 0.10.0
libtpu: 0.0.40
codegen_flags: <defaults>
</compile_context>

<pallas_src>
import functools

import jax
import jax.numpy as jnp
from jax.experimental import pallas as pl
from jax.experimental.pallas import tpu as pltpu

IN_FEATURES = 10
OUT_FEATURES = 2

# Batch tile for the large-B grid path.  Multiple of 8 (sublane tile).  An f32
# (TB, 10) block pads to (TB, 128) lanes in VMEM (~512 B/row, ~1 KiB/row with
# double buffering), so TB=512 costs ~0.5 MiB -- safe even on v7x (64 MiB
# physical / 32 MiB default scoped VMEM) while already near the measured ~85%
# of HBM roofline for 512-row tiles.
_TILE_B = 512


def _linear_kernel(x_ref, w_ref, b_ref, o_ref):
    """y[r, o] = sum_k x[r, k] * w[o, k] + b[o]  for one batch tile."""
    x = x_ref[...].astype(jnp.float32)   # (TB, IN)
    w = w_ref[...].astype(jnp.float32)   # (OUT, IN) -- native PyTorch layout
    b = b_ref[...].astype(jnp.float32)   # (1, OUT)
    out_features = w.shape[0]            # static (=2): Python-level unroll
    # Per-output broadcast multiply in the native (TB, IN) layout + one XLU
    # lane-reduce each.  No rank-3 intermediate, no MXU (>99% padding at 10x2).
    cols = [
        jnp.sum(x * w[o:o + 1, :], axis=-1, keepdims=True) + b[0, o]
        for o in range(out_features)
    ]
    o_ref[...] = jnp.concatenate(cols, axis=-1).astype(o_ref.dtype)


def prepare_params(weight, bias):
    """One-time parameter prep, hoisted out of the per-call path."""
    return weight, bias.reshape(1, -1)   # weight stays (OUT, IN)


@jax.jit
def _linear_small(x, weight, bias2d):
    """Gridless path: whole problem resident in VMEM (skips grid/pipeline
    bookkeeping that dominates at tiny batch sizes)."""
    B, _ = x.shape
    out_features = weight.shape[0]
    return pl.pallas_call(
        _linear_kernel,
        out_shape=jax.ShapeDtypeStruct((B, out_features), x.dtype),
        in_specs=[
            pl.BlockSpec(memory_space=pltpu.MemorySpace.VMEM),
            pl.BlockSpec(memory_space=pltpu.MemorySpace.VMEM),
            pl.BlockSpec(memory_space=pltpu.MemorySpace.VMEM),
        ],
        out_specs=pl.BlockSpec(memory_space=pltpu.MemorySpace.VMEM),
    )(x, weight, bias2d)


@functools.partial(jax.jit, static_argnames=("tile_b",))
def _linear_tiled(x, weight, bias2d, *, tile_b=_TILE_B):
    """B-tiled path for large batches: HBM-bandwidth bound, so the only job is
    keeping the auto-pipelined DMA full."""
    B, in_features = x.shape
    out_features = weight.shape[0]
    grid = (B // tile_b,)
    return pl.pallas_call(
        _linear_kernel,
        out_shape=jax.ShapeDtypeStruct((B, out_features), x.dtype),
        grid_spec=pltpu.PrefetchScalarGridSpec(
            num_scalar_prefetch=0,
            grid=grid,
            in_specs=[
                pl.BlockSpec((tile_b, in_features), lambda i: (i, 0)),
                # Weight / bias: same (tiny) block every step -> stays resident.
                pl.BlockSpec((out_features, in_features), lambda i: (0, 0)),
                pl.BlockSpec((1, out_features), lambda i: (0, 0)),
            ],
            out_specs=pl.BlockSpec((tile_b, out_features), lambda i: (i, 0)),
        ),
        compiler_params=pltpu.CompilerParams(
            # Batch axis is embarrassingly parallel: shards the grid across
            # v7x's 2 TensorCores (no-op on single-TC v5e/v6e).
            dimension_semantics=("parallel",),
            vmem_limit_bytes=32 * 1024 * 1024,
        ),
    )(x, weight, bias2d)


def linear_pallas(x, weight, bias2d):
    """y = x @ weight.T + bias, matching torch.nn.Linear(10, 2) semantics.

    x:      (B, IN)    float32 (or bf16; kernel accumulates in f32)
    weight: (OUT, IN)  PyTorch layout, consumed as-is (no per-call transpose)
    bias2d: (1, OUT)
    """
    B = x.shape[0]
    if B >= 2 * _TILE_B and B % _TILE_B == 0:
        return _linear_tiled(x, weight, bias2d)
    # Small/irregular batches: gridless whole-array residency.
    return _linear_small(x, weight, bias2d)


if __name__ == "__main__":
    key = jax.random.PRNGKey(0)
    k_x, k_w, k_b, k_xl = jax.random.split(key, 4)

    B, IN, OUT = 8, IN_FEATURES, OUT_FEATURES

    # Deterministic synthetic parameters with nn.Linear(10, 2) shapes/init range.
    bound = 1.0 / jnp.sqrt(IN)
    weight = jax.random.uniform(k_w, (OUT, IN), jnp.float32, -bound, bound)
    bias = jax.random.uniform(k_b, (OUT,), jnp.float32, -bound, bound)

    # One-time parameter prep (kept out of the hot call path).
    weight_p, bias2d = prepare_params(weight, bias)

    # --- Small-batch (shipped size) path -----------------------------------
    x = jax.random.normal(k_x, (B, IN), jnp.float32)
    y = linear_pallas(x, weight_p, bias2d)
    jax.block_until_ready(y)
    y_ref = x @ weight.T + bias
    assert y.shape == (B, OUT)
    assert jnp.allclose(y, y_ref, atol=1e-5, rtol=1e-5)

    # --- Large-batch tiled path (exercises the grid / parallel semantics) ---
    B_large = 4 * _TILE_B
    x_large = jax.random.normal(k_xl, (B_large, IN), jnp.float32)
    y_large = linear_pallas(x_large, weight_p, bias2d)
    jax.block_until_ready(y_large)
    y_large_ref = x_large @ weight.T + bias
    assert y_large.shape == (B_large, OUT)
    assert jnp.allclose(y_large, y_large_ref, atol=1e-5, rtol=1e-5)

    print("KERNEL_OK")
</pallas_src>

<mosaic_0001>
module attributes {stable_mosaic.version = 11 : i64} {
  func.func @_linear_kernel(%arg0: memref<8x10xf32, #tpu.memory_space<vmem>>, %arg1: memref<2x10xf32, #tpu.memory_space<vmem>>, %arg2: memref<1x2xf32, #tpu.memory_space<vmem>>, %arg3: memref<8x2xf32, #tpu.memory_space<vmem>>) attributes {dimension_semantics = [], scalar_prefetch = 0 : i64, scratch_operands = 0 : i64, tpu.core_type = #tpu.core_type<tc>} {
    %c0 = arith.constant 0 : index
    %c0_0 = arith.constant 0 : index
    %0 = vector.load %arg0[%c0, %c0_0] : memref<8x10xf32, #tpu.memory_space<vmem>>, vector<8x10xf32>
    %c0_1 = arith.constant 0 : index
    %c0_2 = arith.constant 0 : index
    %1 = vector.load %arg1[%c0_1, %c0_2] : memref<2x10xf32, #tpu.memory_space<vmem>>, vector<2x10xf32>
    %c0_3 = arith.constant 0 : index
    %c0_4 = arith.constant 0 : index
    %2 = vector.load %arg2[%c0_3, %c0_4] : memref<1x2xf32, #tpu.memory_space<vmem>>, vector<1x2xf32>
    %3 = vector.extract_strided_slice %1 {offsets = [0, 0], sizes = [1, 10], strides = [1, 1]} : vector<2x10xf32> to vector<1x10xf32>
    %4 = vector.broadcast %3 : vector<1x10xf32> to vector<8x10xf32>
    %5 = arith.mulf %0, %4 : vector<8x10xf32>
    %cst = arith.constant dense<0.000000e+00> : vector<8xf32>
    %6 = vector.multi_reduction <add>, %5, %cst [1] : vector<8x10xf32> to vector<8xf32>
    %7 = vector.shape_cast %6 : vector<8xf32> to vector<8x1xf32>
    %8 = vector.extract_strided_slice %2 {offsets = [0, 0], sizes = [1, 1], strides = [1, 1]} : vector<1x2xf32> to vector<1x1xf32>
    %9 = vector.extract %8[0, 0] : f32 from vector<1x1xf32>
    %10 = vector.broadcast %9 : f32 to vector<8x1xf32>
    %11 = arith.addf %7, %10 : vector<8x1xf32>
    %12 = vector.extract_strided_slice %1 {offsets = [1, 0], sizes = [1, 10], strides = [1, 1]} : vector<2x10xf32> to vector<1x10xf32>
    %13 = vector.broadcast %12 : vector<1x10xf32> to vector<8x10xf32>
    %14 = arith.mulf %0, %13 : vector<8x10xf32>
    %cst_5 = arith.constant dense<0.000000e+00> : vector<8xf32>
    %15 = vector.multi_reduction <add>, %14, %cst_5 [1] : vector<8x10xf32> to vector<8xf32>
    %16 = vector.shape_cast %15 : vector<8xf32> to vector<8x1xf32>
    %17 = vector.extract_strided_slice %2 {offsets = [0, 1], sizes = [1, 1], strides = [1, 1]} : vector<1x2xf32> to vector<1x1xf32>
    %18 = vector.extract %17[0, 0] : f32 from vector<1x1xf32>
    %19 = vector.broadcast %18 : f32 to vector<8x1xf32>
    %20 = arith.addf %16, %19 : vector<8x1xf32>
    %21 = tpu.concatenate %11, %20 in 1 : vector<8x1xf32>, vector<8x1xf32> -> vector<8x2xf32>
    %c0_6 = arith.constant 0 : index
    %c0_7 = arith.constant 0 : index
    %22 = vector.load %arg3[%c0_6, %c0_7] : memref<8x2xf32, #tpu.memory_space<vmem>>, vector<8x2xf32>
    tpu.vector_store %arg3[%c0_6, %c0_7], %21 {strides = array<i32>} : memref<8x2xf32, #tpu.memory_space<vmem>>, vector<8x2xf32>,
    return
  }
}

</mosaic_0001>

<bundles_post_ra>
// kernel: _linear_small.1
= control target key start
LH: loop header
LB: loop body
LE: loop exit
PB: predicated region body
PF: predicated region fallthrough
CT: control target
= control target key end

     0   :  { %8 = vsyncpa [#allocation3], 0  ;;  %s168_s0 = inlined_call_operand.hbm [shape: f32[8,10], index: 0, kind: input, shape index: {}]   ;;  %s169_s1 = inlined_call_operand.hbm [shape: f32[2,10], index: 1, kind: input, shape index: {}]   ;;  %s170_s2 = inlined_call_operand.vmem [shape: f32[1,2], index: 2, kind: input, shape index: {}]   ;;  %s171_s3 = inlined_call_operand.vmem [shape: f32[8,2], index: 3, kind: output, shape index: {}]  }
   0x1   :  { %s15_s14 = sshll.u32 %s168_s0, 4  ;;  %s16_s14 = int_to_ptr.hbm [resolvable:$true] %s15_s14 }
   0x2   :  { %9 = vsyncpa [#allocation5], 0  ;;  %s133_s15 = smov [#allocation2]   ;;  %s26_s19 = sshll.u32 %s169_s1, 4  ;;  %s27_s19 = int_to_ptr.hbm [resolvable:$true] %s26_s19 }
   0x3   :  { %s17_s16 = sshll.u32 %s133_s15, 4  ;;  %s134_s20 = smov [#allocation4]   ;;  %s18_s16 = int_to_ptr.vmem [resolvable:$true] %s17_s16 }
   0x4   :  { %20 = dma.hbm_to_vmem [thread:$0]  %s16_s14, 128, %s18_s16, [#allocation3]  }
   0x5   :  { %s28_s21 = sshll.u32 %s134_s20, 4  ;;  %s29_s21 = int_to_ptr.vmem [resolvable:$true] %s28_s21 }
   0x6   :  { %31 = dma.hbm_to_vmem [thread:$0]  %s27_s19, 32, %s29_s21, [#allocation5]  }
   0x7   :  { %129 = dma.done.wait [#allocation3], 128  }
   0x8   :  { %130 = vsyncadd [#allocation3], 4294967168 }
   0x9   :  { %131 = dma.done.wait [#allocation5], 32  }
   0xa   :  { %132 = vsyncadd [#allocation5], 4294967264  ;;  %v44_v0 = vld [vmem:[%s170_s2] sm:$0x1]  ;;  %v43_v2 = vld [vmem:[#allocation4] sm:$0x3] }
   0xb   :  { %v42_v1 = vld [vmem:[#allocation2] sm:$0xff]  ;;  %s135_s23 = smov 127   ;;  %v54_v3 = vperm.slane %v43_v2, 1  ;;  %74 = vpush %v44_v0  ;;  %vm47_vm0 = vcmask 80896   ;;  %v45_v6 = vperm.slane %v43_v2, 0  ;;  %vm64_vm1 = vcmask 7168  }
   0xc   :  { %59 = vrot.lane.b32.xlu0 %v44_v0, %s135_s23  ;;  %vm66_vm2 = vcmask 15360  }
   0xd   :  { %v55_v4 = vmul.f32 %v54_v3, %v42_v1  ;;  %v46_v7 = vmul.f32 %v45_v6, %v42_v1 }
   0xf   :  { %v56_v5 = vsel %vm47_vm0, %v55_v4, 0.0  ;;  %v48_v8 = vsel %vm47_vm0, %v46_v7, 0.0 }
  0x10   :  { %57 = vadd.xlane.f32.xlu1 %v56_v5 }
  0x36   :  { %49 = vadd.xlane.f32.xlu0 %v48_v8 }
  0x3c   :  { %s75_s1 = spop %74 }
  0x3d   :  { %v52_v10 = vstv %s75_s1 }
  0x7e   :  { %v60_v9 = vpop.permute.xlu0 %59 }
  0x7f   :  { %76 = vpush %v60_v9 }
  0x83   :  { %v58_v12 = vpop.xlane.xlu1 %57 }
  0xa9   :  { %v50_v11 = vpop.xlane.xlu0 %49 }
  0xaa   :  { %v53_v13 = vadd.f32 %v52_v10, %v50_v11 }
  0xb0   :  { %s77_s2 = spop %76 }
  0xb1   :  { %v62_v14 = vstv %s77_s2 }
  0xb2   :  { %v63_v15 = vadd.f32 %v62_v14, %v58_v12 }
  0xb4   :  { %v65_v16 = vsel %vm64_vm1, %v53_v13, %v63_v15 }
  0xb5   :  { %67 = vst.msk [vmem:[%s171_s3] sm:$0xff] %vm66_vm2, %v65_v16 }
  0xb6   :  { %72 = vsyncpa [#allocation3], 1 }
  0xb7   :  { %73 = vsyncpa [#allocation5], 1 }

</bundles_post_ra>
